<compile_context>
chip_gen: v7x
topology: tpu7x:2x2x1
jax: 0.10.0
libtpu: 0.0.40
codegen_flags: <defaults>
</compile_context>

<pallas_src>
import jax
import jax.numpy as jnp
import numpy as np
from jax.experimental import pallas as pl
from jax.experimental.pallas import tpu as pltpu


# ----------------------------------------------------------------------------- kernel
def attn_decoder_kernel(x_ref, h0_ref, enc_ref, w_gru_ref, b_gru_ref, w_attn_ref,
                        w_cat_ref, w_out_ref, b_misc_ref, out_ref, h_scratch):
    f32 = jnp.float32
    bf16 = jnp.bfloat16
    H_out = w_gru_ref.shape[1] // 4
    H_in = w_gru_ref.shape[0] - H_out
    S = enc_ref.shape[1]
    E = enc_ref.shape[2]
    OS = w_out_ref.shape[1]

    # Step 0: load the initial hidden state into the carried VMEM scratch.
    @pl.when(pl.program_id(0) == 0)
    def _():
        h_scratch[...] = h0_ref[...]

    x = x_ref[...]                       # (B, H_in)  bf16 (streamed per step)
    h_prev = h_scratch[...]              # (B, H_out) f32  (carried across grid steps)
    enc = enc_ref[...]                   # (B, S, E)  bf16 (VMEM-resident across all steps)

    # ---- GRU cell (PyTorch gate order r, z, n) ----
    # Packed weight columns: [r | z | n_input | n_hidden]; two bf16 dots, f32 accumulate
    # (replaces the wrapper-side [x|h] concat).
    gates = (jnp.dot(x, w_gru_ref[0:H_in, :], preferred_element_type=f32)
             + jnp.dot(h_prev.astype(bf16), w_gru_ref[H_in:H_in + H_out, :],
                       preferred_element_type=f32)
             + b_gru_ref[...])
    r = jax.nn.sigmoid(gates[:, 0 * H_out:1 * H_out])
    z = jax.nn.sigmoid(gates[:, 1 * H_out:2 * H_out])
    n = jnp.tanh(gates[:, 2 * H_out:3 * H_out] + r * gates[:, 3 * H_out:4 * H_out])
    h_new = (1.0 - z) * n + z * h_prev                       # (B, H_out) f32
    h_scratch[...] = h_new                                   # carry to next decode step

    # ---- Attn 'general': score(h,e) = h.(W e + b) = (h W).e + h.b ;
    #      h.b is constant over the softmax axis so it cancels (b_attn not needed). ----
    hg = jnp.dot(h_new.astype(bf16), w_attn_ref[...], preferred_element_type=f32)   # (B, E)
    scores = jnp.sum(hg[:, None, :] * enc, axis=-1)                                  # (B, S) f32

    # softmax over S (f32 elementwise; denom reciprocal on the EUP)
    m = jnp.max(scores, axis=-1, keepdims=True)
    e = jnp.exp(scores - m)
    attn = e * pl.reciprocal(jnp.sum(e, axis=-1, keepdims=True), approx=True)        # (B, S)

    # ---- context = attn_weights.bmm(encoder_outputs.transpose(0,1)) ----
    context = jnp.sum(attn[:, :, None] * enc, axis=1)                                # (B, E) f32

    # ---- concat Linear on [h_new | context]: two accumulating dots (no lane concat), tanh ----
    cc = (jnp.dot(h_new.astype(bf16), w_cat_ref[0:H_out, :], preferred_element_type=f32)
          + jnp.dot(context.astype(bf16), w_cat_ref[H_out:H_out + E, :],
                    preferred_element_type=f32)
          + b_misc_ref[0:1, :])
    concat_out = jnp.tanh(cc)

    # ---- out Linear + sigmoid ----
    output = jax.nn.sigmoid(
        jnp.dot(concat_out.astype(bf16), w_out_ref[...], preferred_element_type=f32)
        + b_misc_ref[1:2, :])

    # ---- single unmasked lane-dense store: [output | h_new | attn | zero pad] ----
    pad = out_ref.shape[1] - (OS + H_out + S)
    parts = [output, h_new, attn]
    if pad:
        parts.append(jnp.zeros((output.shape[0], pad), f32))   # keep pad lanes defined (zero)
    out_ref[...] = jnp.concatenate(parts, axis=-1)


# ----------------------------------------------------------------------------- params
def init_params(key, hidden_size, output_size, encoder_output_size):
    """Deterministic synthetic parameters matching the PyTorch module's shapes."""
    H_in, H_out, H = hidden_size, output_size, hidden_size
    ks = jax.random.split(key, 12)

    def u(k, shape, fan_in):
        bound = 1.0 / np.sqrt(fan_in)
        return jax.random.uniform(k, shape, jnp.float32, -bound, bound)

    p = {}
    # nn.GRU(hidden_size, output_size, n_layers=1)
    p["w_ih"] = u(ks[0], (3 * H_out, H_in), H_out)
    p["w_hh"] = u(ks[1], (3 * H_out, H_out), H_out)
    p["b_ih"] = u(ks[2], (3 * H_out,), H_out)
    p["b_hh"] = u(ks[3], (3 * H_out,), H_out)
    # Attn('general', hidden_size): nn.Linear(hidden_size, hidden_size)
    p["w_attn"] = u(ks[4], (H, H), H)
    p["b_attn"] = u(ks[5], (H,), H)
    # nn.Linear(hidden_size * 2, hidden_size)
    p["w_concat"] = u(ks[6], (H, 2 * H), 2 * H)
    p["b_concat"] = u(ks[7], (H,), 2 * H)
    # nn.Linear(hidden_size, output_size)
    p["w_out"] = u(ks[8], (output_size, H), H)
    p["b_out"] = u(ks[9], (output_size,), H)
    # nn.Linear(encoder_output_size, output_size) -- defined in __init__ but unused in forward
    p["w_hidden_linear"] = u(ks[10], (output_size, encoder_output_size), encoder_output_size)
    p["b_hidden_linear"] = u(ks[11], (output_size,), encoder_output_size)
    return p


def pack_params(params):
    """One-time wrapper-side packing (hoisted out of the decode loop). Matmul operands -> bf16."""
    f32, bf16 = jnp.float32, jnp.bfloat16
    w_ih = params["w_ih"].astype(f32)          # (3*H_out, H_in)
    w_hh = params["w_hh"].astype(f32)          # (3*H_out, H_out)
    H_out = w_hh.shape[1]
    H_in = w_ih.shape[1]

    w_ir, w_iz, w_in_ = jnp.split(w_ih, 3, axis=0)
    w_hr, w_hz, w_hn = jnp.split(w_hh, 3, axis=0)
    b_ir, b_iz, b_in_ = jnp.split(params["b_ih"].astype(f32), 3)
    b_hr, b_hz, b_hn = jnp.split(params["b_hh"].astype(f32), 3)

    # Packed GRU weight, lane groups [r | z | n_input | n_hidden].
    # Kernel uses rows [0:H_in] against x and rows [H_in:] against h (two accumulating dots).
    top = jnp.concatenate([w_ir.T, w_iz.T, w_in_.T, jnp.zeros((H_in, H_out), f32)], axis=1)
    bot = jnp.concatenate([w_hr.T, w_hz.T, jnp.zeros((H_out, H_out), f32), w_hn.T], axis=1)
    w_gru = jnp.concatenate([top, bot], axis=0).astype(bf16)             # (H_in+H_out, 4*H_out)
    b_gru = jnp.concatenate([b_ir + b_hr, b_iz + b_hz, b_in_, b_hn]).reshape(1, -1)   # f32

    # hidden_size == output_size (required by 'general' + concat path) -> biases stack cleanly.
    b_misc = jnp.stack([params["b_concat"].astype(f32), params["b_out"].astype(f32)], axis=0)

    return {
        "w_gru": w_gru,                                    # (2H, 4H) bf16
        "b_gru": b_gru,                                    # (1, 4H)  f32
        "w_attn": params["w_attn"].astype(bf16),           # (H, E), used as h @ W (bias cancels)
        "w_cat": params["w_concat"].T.astype(bf16),        # (2H, H): rows [h_new | context]
        "w_out": params["w_out"].T.astype(bf16),           # (H, output_size)
        "b_misc": b_misc,                                  # (2, H): [b_concat, b_out]  f32
    }


def prepare_encoder_outputs(encoder_outputs):
    """Loop-invariant prep, done ONCE per sequence: (S,B,E) seq-major -> (B,S,E) bf16."""
    return jnp.transpose(encoder_outputs, (1, 0, 2)).astype(jnp.bfloat16)


# ----------------------------------------------------------------------------- wrappers
def _decode_pallas(packed, x_seq, h0, enc):
    """x_seq: (T,B,H_in) bf16; h0: (B,H_out) f32; enc: (B,S,E) bf16 -> slab (T,B,slab_pad) f32."""
    T, B, H_in = x_seq.shape
    H_out = h0.shape[-1]
    S, E = enc.shape[1], enc.shape[2]
    OS = packed["w_out"].shape[1]
    slab_w = OS + H_out + S
    slab_pad = ((slab_w + 127) // 128) * 128          # lane-dense output -> unmasked vst

    def resident(a):                                   # whole array, DMA'd once, stays in VMEM
        return pl.BlockSpec(a.shape, lambda *_, n=a.ndim: (0,) * n)

    in_specs = [
        pl.BlockSpec((None, B, H_in), lambda t: (t, 0, 0)),   # x_t streamed per step (tiny)
        resident(h0),                                         # initial hidden
        resident(enc),                                        # encoder outputs (resident)
        resident(packed["w_gru"]), resident(packed["b_gru"]),
        resident(packed["w_attn"]), resident(packed["w_cat"]),
        resident(packed["w_out"]), resident(packed["b_misc"]),
    ]
    return pl.pallas_call(
        attn_decoder_kernel,
        grid=(T,),
        in_specs=in_specs,
        out_specs=pl.BlockSpec((None, B, slab_pad), lambda t: (t, 0, 0)),
        out_shape=jax.ShapeDtypeStruct((T, B, slab_pad), jnp.float32),
        scratch_shapes=[pltpu.VMEM((B, H_out), jnp.float32)],     # carried GRU hidden
        compiler_params=pltpu.CompilerParams(
            dimension_semantics=("arbitrary",)),   # sequential recurrence: never core-split
    )(x_seq, h0, enc, packed["w_gru"], packed["b_gru"], packed["w_attn"],
      packed["w_cat"], packed["w_out"], packed["b_misc"])


@jax.jit
def attn_decoder_decode(packed, x_seq, h0, enc):
    """
    Fused T-step decode: ONE pallas_call runs all T steps, hidden carried on-chip,
    weights + encoder outputs VMEM-resident for the whole call.
      x_seq : (T, B, hidden_size)  per-step decoder inputs (e.g. teacher forcing)
      h0    : (B, output_size)     initial GRU hidden
      enc   : (B, S, E)            from prepare_encoder_outputs()
    returns (outputs (T,B,output_size), hiddens (T,B,output_size), attn_weights (T,B,S))
    """
    H_out = h0.shape[-1]
    S = enc.shape[1]
    OS = packed["w_out"].shape[1]
    slab = _decode_pallas(packed, x_seq.astype(jnp.bfloat16), h0.astype(jnp.float32),
                          enc.astype(jnp.bfloat16))
    return (slab[..., 0:OS], slab[..., OS:OS + H_out], slab[..., OS + H_out:OS + H_out + S])


@jax.jit
def attn_decoder_forward(packed, input_seq, last_hidden, encoder_outputs):
    """
    API-compatible single decode step (PyTorch AttnDecoderRNN.forward signature).
      input_seq (B,H), last_hidden (1,B,H_out), encoder_outputs (S,B,E)  ->
      (output (B,OS), hidden (1,B,H_out), attn_weights (B,1,S))
    For a real decode loop, prefer prepare_encoder_outputs() once + attn_decoder_decode().
    """
    H_out = last_hidden.shape[-1]
    S = encoder_outputs.shape[0]
    OS = packed["w_out"].shape[1]
    enc = jnp.transpose(encoder_outputs, (1, 0, 2)).astype(jnp.bfloat16)
    slab = _decode_pallas(packed, input_seq.astype(jnp.bfloat16)[None],
                          last_hidden[0].astype(jnp.float32), enc)
    output = slab[0, :, 0:OS]
    h_new = slab[0, :, OS:OS + H_out]
    attn = slab[0, :, OS + H_out:OS + H_out + S]
    return output, h_new[None], attn[:, None, :]


# ----------------------------------------------------------------------------- references
def reference_forward(params, input_seq, last_hidden, encoder_outputs):
    """Pure-JAX f32 reference mirroring the PyTorch forward (single step)."""
    x = input_seq
    h = last_hidden[0]
    gi = x @ params["w_ih"].T + params["b_ih"]
    gh = h @ params["w_hh"].T + params["b_hh"]
    i_r, i_z, i_n = jnp.split(gi, 3, axis=1)
    h_r, h_z, h_n = jnp.split(gh, 3, axis=1)
    r = jax.nn.sigmoid(i_r + h_r)
    z = jax.nn.sigmoid(i_z + h_z)
    n = jnp.tanh(i_n + r * h_n)
    h_new = (1.0 - z) * n + z * h
    enc = jnp.transpose(encoder_outputs, (1, 0, 2))
    enc_g = enc @ params["w_attn"].T + params["b_attn"]
    scores = jnp.einsum("bh,bsh->bs", h_new, enc_g)
    attn = jax.nn.softmax(scores, axis=-1)
    context = jnp.einsum("bs,bse->be", attn, enc)
    concat_in = jnp.concatenate([h_new, context], axis=1)
    concat_out = jnp.tanh(concat_in @ params["w_concat"].T + params["b_concat"])
    output = jax.nn.sigmoid(concat_out @ params["w_out"].T + params["b_out"])
    return output, h_new[None], attn[:, None, :]


def reference_decode_like_kernel(params, x_seq, h0, encoder_outputs):
    """Pure-JAX T-step reference mirroring the kernel's bf16-operand / f32-accumulate math
    (exact softmax division instead of the EUP approx reciprocal)."""
    f32, bf16 = jnp.float32, jnp.bfloat16

    def bdot(a, b):
        return jnp.dot(a.astype(bf16), b.astype(bf16), preferred_element_type=f32)

    H = h0.shape[-1]
    enc = jnp.transpose(encoder_outputs, (1, 0, 2)).astype(bf16).astype(f32)
    w_ih_t, w_hh_t = params["w_ih"].T, params["w_hh"].T
    h = h0.astype(f32)
    outs, hids, attns = [], [], []
    for t in range(x_seq.shape[0]):
        x = x_seq[t]
        gi = bdot(x, w_ih_t) + params["b_ih"]
        gh = bdot(h, w_hh_t) + params["b_hh"]
        i_r, i_z, i_n = jnp.split(gi, 3, axis=1)
        h_r, h_z, h_n = jnp.split(gh, 3, axis=1)
        r = jax.nn.sigmoid(i_r + h_r)
        z = jax.nn.sigmoid(i_z + h_z)
        n = jnp.tanh(i_n + r * h_n)
        h = (1.0 - z) * n + z * h
        hg = bdot(h, params["w_attn"])                       # bias cancels in the softmax
        scores = jnp.einsum("be,bse->bs", hg, enc)
        attn = jax.nn.softmax(scores, axis=-1)
        context = jnp.einsum("bs,bse->be", attn, enc)
        cc = (bdot(h, params["w_concat"][:, :H].T)
              + bdot(context, params["w_concat"][:, H:].T) + params["b_concat"])
        concat_out = jnp.tanh(cc)
        output = jax.nn.sigmoid(bdot(concat_out, params["w_out"].T) + params["b_out"])
        outs.append(output); hids.append(h); attns.append(attn)
    return jnp.stack(outs), jnp.stack(hids), jnp.stack(attns)


# ----------------------------------------------------------------------------- main
if __name__ == "__main__":
    # hidden_size == output_size == encoder feature dim is required for the module's
    # 'general' attention + concat layer to be shape-consistent. B=8 fills the sublanes.
    hidden_size = 32
    output_size = 32
    encoder_output_size = 32
    B, S, T = 8, 8, 16

    key = jax.random.PRNGKey(0)
    kp, k1, k2, k3, k4 = jax.random.split(key, 5)
    params = init_params(kp, hidden_size, output_size, encoder_output_size)
    packed = pack_params(params)            # hoisted: done once, not per decode step

    input_seq = jax.random.normal(k1, (B, hidden_size), jnp.float32)
    last_hidden = jax.random.normal(k2, (1, B, output_size), jnp.float32)
    encoder_outputs = jax.random.normal(k3, (S, B, encoder_output_size), jnp.float32)
    x_seq = jax.random.normal(k4, (T, B, hidden_size), jnp.float32)

    # ---- 1) Single step: exact PyTorch forward() signature & semantics ----
    out, hid, attn_w = attn_decoder_forward(packed, input_seq, last_hidden, encoder_outputs)
    out, hid, attn_w = jax.block_until_ready((out, hid, attn_w))
    assert out.shape == (B, output_size)
    assert hid.shape == (1, B, output_size)
    assert attn_w.shape == (B, 1, S)

    ref_out, ref_hid, ref_attn = reference_forward(params, input_seq, last_hidden, encoder_outputs)
    # bf16 MXU operands (f32 accumulate) vs. the pure-f32 reference.
    np.testing.assert_allclose(np.asarray(out), np.asarray(ref_out), rtol=2e-2, atol=1e-2)
    np.testing.assert_allclose(np.asarray(hid), np.asarray(ref_hid), rtol=2e-2, atol=1e-2)
    np.testing.assert_allclose(np.asarray(attn_w), np.asarray(ref_attn), rtol=2e-2, atol=1e-2)

    # ---- 2) Fused T-step decode: one pallas_call, hidden carried in VMEM scratch ----
    enc = prepare_encoder_outputs(encoder_outputs)      # hoisted: once per sequence
    outs, hids, attns = attn_decoder_decode(packed, x_seq, last_hidden[0], enc)
    outs, hids, attns = jax.block_until_ready((outs, hids, attns))
    assert outs.shape == (T, B, output_size)
    assert hids.shape == (T, B, output_size)
    assert attns.shape == (T, B, S)

    ref_outs, ref_hids, ref_attns = reference_decode_like_kernel(
        params, x_seq, last_hidden[0], encoder_outputs)
    np.testing.assert_allclose(np.asarray(outs), np.asarray(ref_outs), rtol=2e-2, atol=2e-3)
    np.testing.assert_allclose(np.asarray(hids), np.asarray(ref_hids), rtol=2e-2, atol=2e-3)
    np.testing.assert_allclose(np.asarray(attns), np.asarray(ref_attns), rtol=2e-2, atol=2e-3)

    print("KERNEL_OK")
</pallas_src>

<mosaic_0001>
module attributes {stable_mosaic.version = 11 : i64} {
  func.func @attn_decoder_kernel(%arg0: i32, %arg1: memref<1x8x32xbf16, #tpu.memory_space<vmem>>, %arg2: memref<8x32xf32, #tpu.memory_space<vmem>>, %arg3: memref<8x8x32xbf16, #tpu.memory_space<vmem>>, %arg4: memref<64x128xbf16, #tpu.memory_space<vmem>>, %arg5: memref<1x128xf32, #tpu.memory_space<vmem>>, %arg6: memref<32x32xbf16, #tpu.memory_space<vmem>>, %arg7: memref<64x32xbf16, #tpu.memory_space<vmem>>, %arg8: memref<32x32xbf16, #tpu.memory_space<vmem>>, %arg9: memref<2x32xf32, #tpu.memory_space<vmem>>, %arg10: memref<1x8x128xf32, #tpu.memory_space<vmem>>, %arg11: memref<8x32xf32, #tpu.memory_space<vmem>>) attributes {dimension_semantics = [#tpu.dimension_semantics<arbitrary>], iteration_bounds = array<i64: 1>, scalar_prefetch = 0 : i64, scratch_operands = 1 : i64, tpu.core_type = #tpu.core_type<tc>, window_params = [{transform_indices = @transform_0, window_bounds = array<i64: 1, 8, 32>}, {pipeline_mode = #tpu.pipeline_mode<synchronous>, transform_indices = @transform_1, window_bounds = array<i64: 8, 32>}, {pipeline_mode = #tpu.pipeline_mode<synchronous>, transform_indices = @transform_2, window_bounds = array<i64: 8, 8, 32>}, {pipeline_mode = #tpu.pipeline_mode<synchronous>, transform_indices = @transform_3, window_bounds = array<i64: 64, 128>}, {pipeline_mode = #tpu.pipeline_mode<synchronous>, transform_indices = @transform_4, window_bounds = array<i64: 1, 128>}, {pipeline_mode = #tpu.pipeline_mode<synchronous>, transform_indices = @transform_5, window_bounds = array<i64: 32, 32>}, {pipeline_mode = #tpu.pipeline_mode<synchronous>, transform_indices = @transform_6, window_bounds = array<i64: 64, 32>}, {pipeline_mode = #tpu.pipeline_mode<synchronous>, transform_indices = @transform_7, window_bounds = array<i64: 32, 32>}, {pipeline_mode = #tpu.pipeline_mode<synchronous>, transform_indices = @transform_8, window_bounds = array<i64: 2, 32>}, {transform_indices = @transform_9, window_bounds = array<i64: 1, 8, 128>}]} {
    %c0_i32 = arith.constant 0 : i32
    %0 = arith.cmpi eq, %arg0, %c0_i32 : i32
    %1 = arith.extui %0 : i1 to i32
    %c0_i32_0 = arith.constant 0 : i32
    %2 = arith.cmpi ne, %1, %c0_i32_0 : i32
    scf.if %2 {
      %c0_43 = arith.constant 0 : index
      %c0_44 = arith.constant 0 : index
      %89 = vector.load %arg2[%c0_43, %c0_44] : memref<8x32xf32, #tpu.memory_space<vmem>>, vector<8x32xf32>
      %c0_45 = arith.constant 0 : index
      %c0_46 = arith.constant 0 : index
      %90 = vector.load %arg11[%c0_45, %c0_46] : memref<8x32xf32, #tpu.memory_space<vmem>>, vector<8x32xf32>
      tpu.vector_store %arg11[%c0_45, %c0_46], %89 {strides = array<i32>} : memref<8x32xf32, #tpu.memory_space<vmem>>, vector<8x32xf32>,
    } else {
    }
    %c0 = arith.constant 0 : index
    %c0_1 = arith.constant 0 : index
    %c0_2 = arith.constant 0 : index
    %3 = vector.load %arg1[%c0, %c0_1, %c0_2] : memref<1x8x32xbf16, #tpu.memory_space<vmem>>, vector<1x8x32xbf16>
    %4 = vector.shape_cast %3 : vector<1x8x32xbf16> to vector<8x32xbf16>
    %c0_3 = arith.constant 0 : index
    %c0_4 = arith.constant 0 : index
    %5 = vector.load %arg11[%c0_3, %c0_4] : memref<8x32xf32, #tpu.memory_space<vmem>>, vector<8x32xf32>
    %c0_5 = arith.constant 0 : index
    %c0_6 = arith.constant 0 : index
    %c0_7 = arith.constant 0 : index
    %6 = vector.load %arg3[%c0_5, %c0_6, %c0_7] : memref<8x8x32xbf16, #tpu.memory_space<vmem>>, vector<8x8x32xbf16>
    %c0_8 = arith.constant 0 : index
    %c0_9 = arith.constant 0 : index
    %7 = vector.load %arg4[%c0_8, %c0_9] : memref<64x128xbf16, #tpu.memory_space<vmem>>, vector<32x128xbf16>
    %cst = arith.constant dense<0.000000e+00> : vector<8x128xf32>
    %8 = tpu.matmul %4, %7, %cst {dimension_numbers = #tpu.dot_dimension_numbers<[1], [0], [0], [1], [0, 0, 1, 1], [], []>} : vector<8x32xbf16>, vector<32x128xbf16>, vector<8x128xf32> -> vector<8x128xf32>
    %9 = arith.truncf %5 : vector<8x32xf32> to vector<8x32xbf16>
    %c32 = arith.constant 32 : index
    %c0_10 = arith.constant 0 : index
    %10 = vector.load %arg4[%c32, %c0_10] : memref<64x128xbf16, #tpu.memory_space<vmem>>, vector<32x128xbf16>
    %cst_11 = arith.constant dense<0.000000e+00> : vector<8x128xf32>
    %11 = tpu.matmul %9, %10, %cst_11 {dimension_numbers = #tpu.dot_dimension_numbers<[1], [0], [0], [1], [0, 0, 1, 1], [], []>} : vector<8x32xbf16>, vector<32x128xbf16>, vector<8x128xf32> -> vector<8x128xf32>
    %12 = arith.addf %8, %11 : vector<8x128xf32>
    %c0_12 = arith.constant 0 : index
    %c0_13 = arith.constant 0 : index
    %13 = vector.load %arg5[%c0_12, %c0_13] : memref<1x128xf32, #tpu.memory_space<vmem>>, vector<1x128xf32>
    %14 = vector.broadcast %13 : vector<1x128xf32> to vector<8x128xf32>
    %15 = arith.addf %12, %14 : vector<8x128xf32>
    %16 = vector.extract_strided_slice %15 {offsets = [0, 0], sizes = [8, 32], strides = [1, 1]} : vector<8x128xf32> to vector<8x32xf32>
    %17 = arith.negf %16 : vector<8x32xf32>
    %18 = math.exp %17 : vector<8x32xf32>
    %cst_14 = arith.constant 1.000000e+00 : f32
    %19 = vector.broadcast %cst_14 : f32 to vector<8x32xf32>
    %20 = arith.addf %19, %18 : vector<8x32xf32>
    %21 = arith.divf %19, %20 : vector<8x32xf32>
    %22 = vector.extract_strided_slice %15 {offsets = [0, 32], sizes = [8, 32], strides = [1, 1]} : vector<8x128xf32> to vector<8x32xf32>
    %23 = arith.negf %22 : vector<8x32xf32>
    %24 = math.exp %23 : vector<8x32xf32>
    %cst_15 = arith.constant 1.000000e+00 : f32
    %25 = vector.broadcast %cst_15 : f32 to vector<8x32xf32>
    %26 = arith.addf %25, %24 : vector<8x32xf32>
    %27 = arith.divf %25, %26 : vector<8x32xf32>
    %28 = vector.extract_strided_slice %15 {offsets = [0, 64], sizes = [8, 32], strides = [1, 1]} : vector<8x128xf32> to vector<8x32xf32>
    %29 = vector.extract_strided_slice %15 {offsets = [0, 96], sizes = [8, 32], strides = [1, 1]} : vector<8x128xf32> to vector<8x32xf32>
    %30 = arith.mulf %21, %29 : vector<8x32xf32>
    %31 = arith.addf %28, %30 : vector<8x32xf32>
    %32 = math.tanh %31 : vector<8x32xf32>
    %cst_16 = arith.constant 1.000000e+00 : f32
    %33 = vector.broadcast %cst_16 : f32 to vector<8x32xf32>
    %34 = arith.subf %33, %27 : vector<8x32xf32>
    %35 = arith.mulf %34, %32 : vector<8x32xf32>
    %36 = arith.mulf %27, %5 : vector<8x32xf32>
    %37 = arith.addf %35, %36 : vector<8x32xf32>
    %c0_17 = arith.constant 0 : index
    %c0_18 = arith.constant 0 : index
    %38 = vector.load %arg11[%c0_17, %c0_18] : memref<8x32xf32, #tpu.memory_space<vmem>>, vector<8x32xf32>
    tpu.vector_store %arg11[%c0_17, %c0_18], %37 {strides = array<i32>} : memref<8x32xf32, #tpu.memory_space<vmem>>, vector<8x32xf32>,
    %39 = arith.truncf %37 : vector<8x32xf32> to vector<8x32xbf16>
    %c0_19 = arith.constant 0 : index
    %c0_20 = arith.constant 0 : index
    %40 = vector.load %arg6[%c0_19, %c0_20] : memref<32x32xbf16, #tpu.memory_space<vmem>>, vector<32x32xbf16>
    %cst_21 = arith.constant dense<0.000000e+00> : vector<8x32xf32>
    %41 = tpu.matmul %39, %40, %cst_21 {dimension_numbers = #tpu.dot_dimension_numbers<[1], [0], [0], [1], [0, 0, 1, 1], [], []>} : vector<8x32xbf16>, vector<32x32xbf16>, vector<8x32xf32> -> vector<8x32xf32>
    %42 = vector.shape_cast %41 : vector<8x32xf32> to vector<8x1x32xf32>
    %43 = arith.extf %6 : vector<8x8x32xbf16> to vector<8x8x32xf32>
    %44 = vector.broadcast %42 : vector<8x1x32xf32> to vector<8x8x32xf32>
    %45 = arith.mulf %44, %43 : vector<8x8x32xf32>
    %cst_22 = arith.constant dense<0.000000e+00> : vector<8x8xf32>
    %46 = vector.multi_reduction <add>, %45, %cst_22 [2] : vector<8x8x32xf32> to vector<8x8xf32>
    %cst_23 = arith.constant dense<0xFF800000> : vector<8xf32>
    %47 = vector.multi_reduction <maximumf>, %46, %cst_23 [1] : vector<8x8xf32> to vector<8xf32>
    %48 = vector.shape_cast %47 : vector<8xf32> to vector<8x1xf32>
    %49 = vector.broadcast %48 : vector<8x1xf32> to vector<8x8xf32>
    %50 = arith.subf %46, %49 : vector<8x8xf32>
    %51 = math.exp %50 : vector<8x8xf32>
    %cst_24 = arith.constant dense<0.000000e+00> : vector<8xf32>
    %52 = vector.multi_reduction <add>, %51, %cst_24 [1] : vector<8x8xf32> to vector<8xf32>
    %53 = vector.shape_cast %52 : vector<8xf32> to vector<8x1xf32>
    %54 = tpu.reciprocal %53 {approx = true} : vector<8x1xf32> -> vector<8x1xf32>
    %55 = vector.broadcast %54 : vector<8x1xf32> to vector<8x8xf32>
    %56 = arith.mulf %51, %55 : vector<8x8xf32>
    %57 = vector.shape_cast %56 : vector<8x8xf32> to vector<8x8x1xf32>
    %58 = arith.extf %6 : vector<8x8x32xbf16> to vector<8x8x32xf32>
    %59 = vector.broadcast %57 : vector<8x8x1xf32> to vector<8x8x32xf32>
    %60 = arith.mulf %59, %58 : vector<8x8x32xf32>
    %cst_25 = arith.constant dense<0.000000e+00> : vector<8x32xf32>
    %61 = vector.multi_reduction <add>, %60, %cst_25 [1] : vector<8x8x32xf32> to vector<8x32xf32>
    %62 = arith.truncf %37 : vector<8x32xf32> to vector<8x32xbf16>
    %c0_26 = arith.constant 0 : index
    %c0_27 = arith.constant 0 : index
    %63 = vector.load %arg7[%c0_26, %c0_27] : memref<64x32xbf16, #tpu.memory_space<vmem>>, vector<32x32xbf16>
    %cst_28 = arith.constant dense<0.000000e+00> : vector<8x32xf32>
    %64 = tpu.matmul %62, %63, %cst_28 {dimension_numbers = #tpu.dot_dimension_numbers<[1], [0], [0], [1], [0, 0, 1, 1], [], []>} : vector<8x32xbf16>, vector<32x32xbf16>, vector<8x32xf32> -> vector<8x32xf32>
    %65 = arith.truncf %61 : vector<8x32xf32> to vector<8x32xbf16>
    %c32_29 = arith.constant 32 : index
    %c0_30 = arith.constant 0 : index
    %66 = vector.load %arg7[%c32_29, %c0_30] : memref<64x32xbf16, #tpu.memory_space<vmem>>, vector<32x32xbf16>
    %cst_31 = arith.constant dense<0.000000e+00> : vector<8x32xf32>
    %67 = tpu.matmul %65, %66, %cst_31 {dimension_numbers = #tpu.dot_dimension_numbers<[1], [0], [0], [1], [0, 0, 1, 1], [], []>} : vector<8x32xbf16>, vector<32x32xbf16>, vector<8x32xf32> -> vector<8x32xf32>
    %68 = arith.addf %64, %67 : vector<8x32xf32>
    %c0_32 = arith.constant 0 : index
    %c0_33 = arith.constant 0 : index
    %69 = vector.load %arg9[%c0_32, %c0_33] : memref<2x32xf32, #tpu.memory_space<vmem>>, vector<1x32xf32>
    %70 = vector.broadcast %69 : vector<1x32xf32> to vector<8x32xf32>
    %71 = arith.addf %68, %70 : vector<8x32xf32>
    %72 = math.tanh %71 : vector<8x32xf32>
    %73 = arith.truncf %72 : vector<8x32xf32> to vector<8x32xbf16>
    %c0_34 = arith.constant 0 : index
    %c0_35 = arith.constant 0 : index
    %74 = vector.load %arg8[%c0_34, %c0_35] : memref<32x32xbf16, #tpu.memory_space<vmem>>, vector<32x32xbf16>
    %cst_36 = arith.constant dense<0.000000e+00> : vector<8x32xf32>
    %75 = tpu.matmul %73, %74, %cst_36 {dimension_numbers = #tpu.dot_dimension_numbers<[1], [0], [0], [1], [0, 0, 1, 1], [], []>} : vector<8x32xbf16>, vector<32x32xbf16>, vector<8x32xf32> -> vector<8x32xf32>
    %c1 = arith.constant 1 : index
    %c0_37 = arith.constant 0 : index
    %76 = vector.load %arg9[%c1, %c0_37] : memref<2x32xf32, #tpu.memory_space<vmem>>, vector<1x32xf32>
    %77 = vector.broadcast %76 : vector<1x32xf32> to vector<8x32xf32>
    %78 = arith.addf %75, %77 : vector<8x32xf32>
    %79 = arith.negf %78 : vector<8x32xf32>
    %80 = math.exp %79 : vector<8x32xf32>
    %cst_38 = arith.constant 1.000000e+00 : f32
    %81 = vector.broadcast %cst_38 : f32 to vector<8x32xf32>
    %82 = arith.addf %81, %80 : vector<8x32xf32>
    %83 = arith.divf %81, %82 : vector<8x32xf32>
    %cst_39 = arith.constant 0.000000e+00 : f32
    %84 = vector.broadcast %cst_39 : f32 to vector<8x56xf32>
    %85 = tpu.concatenate %83, %37, %56, %84 in 1 : vector<8x32xf32>, vector<8x32xf32>, vector<8x8xf32>, vector<8x56xf32> -> vector<8x128xf32>
    %c0_40 = arith.constant 0 : index
    %c0_41 = arith.constant 0 : index
    %c0_42 = arith.constant 0 : index
    %86 = vector.load %arg10[%c0_40, %c0_41, %c0_42] : memref<1x8x128xf32, #tpu.memory_space<vmem>>, vector<1x8x128xf32>
    %87 = vector.shape_cast %86 : vector<1x8x128xf32> to vector<8x128xf32>
    %88 = vector.shape_cast %85 : vector<8x128xf32> to vector<1x8x128xf32>
    tpu.vector_store %arg10[%c0_40, %c0_41, %c0_42], %88 {strides = array<i32>} : memref<1x8x128xf32, #tpu.memory_space<vmem>>, vector<1x8x128xf32>,
    return
  }
  func.func @transform_0(%arg0: i32) -> (i32, i32, i32) {
    %c0_i32 = arith.constant 0 : i32
    %c0_i32_0 = arith.constant 0 : i32
    %c0_i32_1 = arith.constant 0 : i32
    return %arg0, %c0_i32, %c0_i32_0 : i32, i32, i32
  }
  func.func @transform_1(%arg0: i32) -> (i32, i32) {
    %c0_i32 = arith.constant 0 : i32
    %c0_i32_0 = arith.constant 0 : i32
    %c0_i32_1 = arith.constant 0 : i32
    return %c0_i32, %c0_i32_0 : i32, i32
  }
  func.func @transform_2(%arg0: i32) -> (i32, i32, i32) {
    %c0_i32 = arith.constant 0 : i32
    %c0_i32_0 = arith.constant 0 : i32
    %c0_i32_1 = arith.constant 0 : i32
    %c0_i32_2 = arith.constant 0 : i32
    return %c0_i32, %c0_i32_0, %c0_i32_1 : i32, i32, i32
  }
  func.func @transform_3(%arg0: i32) -> (i32, i32) {
    %c0_i32 = arith.constant 0 : i32
    %c0_i32_0 = arith.constant 0 : i32
    %c0_i32_1 = arith.constant 0 : i32
    return %c0_i32, %c0_i32_0 : i32, i32
  }
  func.func @transform_4(%arg0: i32) -> (i32, i32) {
    %c0_i32 = arith.constant 0 : i32
    %c0_i32_0 = arith.constant 0 : i32
    %c0_i32_1 = arith.constant 0 : i32
    return %c0_i32, %c0_i32_0 : i32, i32
  }
  func.func @transform_5(%arg0: i32) -> (i32, i32) {
    %c0_i32 = arith.constant 0 : i32
    %c0_i32_0 = arith.constant 0 : i32
    %c0_i32_1 = arith.constant 0 : i32
    return %c0_i32, %c0_i32_0 : i32, i32
  }
  func.func @transform_6(%arg0: i32) -> (i32, i32) {
    %c0_i32 = arith.constant 0 : i32
    %c0_i32_0 = arith.constant 0 : i32
    %c0_i32_1 = arith.constant 0 : i32
    return %c0_i32, %c0_i32_0 : i32, i32
  }
  func.func @transform_7(%arg0: i32) -> (i32, i32) {
    %c0_i32 = arith.constant 0 : i32
    %c0_i32_0 = arith.constant 0 : i32
    %c0_i32_1 = arith.constant 0 : i32
    return %c0_i32, %c0_i32_0 : i32, i32
  }
  func.func @transform_8(%arg0: i32) -> (i32, i32) {
    %c0_i32 = arith.constant 0 : i32
    %c0_i32_0 = arith.constant 0 : i32
    %c0_i32_1 = arith.constant 0 : i32
    return %c0_i32, %c0_i32_0 : i32, i32
  }
  func.func @transform_9(%arg0: i32) -> (i32, i32, i32) {
    %c0_i32 = arith.constant 0 : i32
    %c0_i32_0 = arith.constant 0 : i32
    %c0_i32_1 = arith.constant 0 : i32
    return %arg0, %c0_i32, %c0_i32_0 : i32, i32, i32
  }
}

</mosaic_0001>

<bundles_post_ra>
// kernel: attn_decoder_forward.1
= control target key start
LH: loop header
LB: loop body
LE: loop exit
PB: predicated region body
PF: predicated region fallthrough
CT: control target
= control target key end

     0   :  { %v1195_v0 = vmov 0.0   ;;  %vm1196_vm0 = vmmov 0   ;;  %vm38_vm1 = vcmask 261120   ;;  %s1198_s21 = smov 64   ;;  %s1199_s23 = smov 96   ;;  %v280_v43 = vlaneseq  ;;  %s1551_s3 = inlined_call_operand.vmem [shape: bf16[64,128], index: 3, kind: input, shape index: {}]   ;;  %s1552_s1 = inlined_call_operand.vmem [shape: f32[8,32], index: 1, kind: input, shape index: {}]   ;;  %s1553_s0 = inlined_call_operand.vmem [shape: bf16[1,8,32], index: 0, kind: input, shape index: {}]   ;;  %s1554_s4 = inlined_call_operand.vmem [shape: f32[1,128], index: 4, kind: input, shape index: {}]   ;;  %s1555_s5 = inlined_call_operand.vmem [shape: bf16[32,32], index: 5, kind: input, shape index: {}]   ;;  %s1556_s6 = inlined_call_operand.vmem [shape: bf16[64,32], index: 6, kind: input, shape index: {}]   ;;  %s1557_s2 = inlined_call_operand.vmem [shape: bf16[8,8,32], index: 2, kind: input, shape index: {}]   ;;  %s1558_s7 = inlined_call_operand.vmem [shape: bf16[32,32], index: 7, kind: input, shape index: {}]   ;;  %s1559_s8 = inlined_call_operand.vmem [shape: f32[2,32], index: 8, kind: input, shape index: {}]   ;;  %s1560_s9 = inlined_call_operand.vmem [shape: f32[1,8,128], index: 9, kind: output, shape index: {}]  }
   0x1   :  { %1104 = vmatprep.subr.bf16.mxu1 %v1195_v0  ;;  %1096 = vmatprep.subr.bf16.mxu0 %v1195_v0  ;;  %v1153_v1 = vld [vmem:[%s1551_s3] sm:$0xff]   ;;  %v1154_v2 = vld [vmem:[%s1551_s3 + $0x10] sm:$0xff]   ;;  %v1155_v3 = vld [vmem:[%s1551_s3 + $0x8] sm:$0xff]   ;;  %v1200_v41 = vmov 1966171168   ;;  %vm447_vm2 = vcmask 1041409  }
   0x2   :  { %1108 = vmatprep.mubr.msk.bf16.mxu1 %vm1196_vm0, %v1195_v0  ;;  %1100 = vmatprep.mubr.msk.bf16.mxu0 %vm1196_vm0, %v1195_v0  ;;  %v1156_v4 = vld [vmem:[%s1551_s3 + $0x18] sm:$0xff]   ;;  %v37_v5 = vld [vmem:[%s1552_s1] sm:$0xff]  ;;  %s1197_s3 = smov 32   ;;  %v1158_v30 = vld [vmem:[%s1555_s5 + $0x8] sm:$0xff]   ;;  %v278_v42 = vunpack.c.l.s4 %v1200_v41  ;;  %v1316_v45 = vshrl.u32 %v280_v43, 7  ;;  %vm449_vm3 = vcmask 1042434  }
   0x3   :  { %1105 = vmatpush3.bf16.msra.mxu1 %v1153_v1  ;;  %1097 = vmatpush3.bf16.msra.mxu0 %v1154_v2  ;;  %39 = vst.msk [vmem:[#allocation2] sm:$0xff] %vm38_vm1, %v37_v5  ;;  %v40_v6 = vld [vmem:[%s1553_s0] sm:$0xf]  ;;  %v1160_v40 = vld [vmem:[%s1556_s6 + $0x8] sm:$0xff]   ;;  %v1340_v5 = vld [vmem:[%s1557_s2 + $0x10] sm:$0xff]   ;;  %vm451_vm4 = vcmask 1043459  }
   0x4   :  { %1106 = vmatprep.subr.bf16.mxu1 %v1195_v0  ;;  %1098 = vmatprep.subr.bf16.mxu0 %v1195_v0  ;;  %v1042_v14 = vld [vmem:[%s1554_s4] ss:$0 sm:$0xff]  ;;  %v279_v44 = vunpack.c.0.s8 %v278_v42  ;;  %v1325_v53 = vsub.s32 0, %v1316_v45  ;;  %v1330_v58 = vld [vmem:[%s1557_s2 + $0x8] sm:$0xff]   ;;  %vm453_vm5 = vcmask 1044484   ;;  %vm455_vm6 = vcmask 1045509  }
   0x5   :  { %v1157_v28 = vld [vmem:[%s1555_s5] sm:$0xff]   ;;  %vm457_vm7 = vcmask 1046534   ;;  %vm459_vm8 = vcmask 1047559   ;;  %vm462_vm9 = vcmask 64512   ;;  %vm1027_vm10 = vcmask 523264  }
   0x6   :  { %v1159_v38 = vld [vmem:[%s1556_s6] sm:$0xff]   ;;  %v282_v46 = vsub.s32 %v279_v44, %v1316_v45  ;;  %v1385_v44 = vand.u32 127, %v280_v43  ;;  %vm1029_vm11 = vcmask 588800  }
   0x7   :  { %1107 = vmatpush3.bf16.msra.mxu1 %v1155_v3  ;;  %1099 = vmatpush3.bf16.msra.mxu0 %v1156_v4  ;;  %v1322_v51 = vld [vmem:[%s1557_s2] sm:$0xff]   ;;  %v1066_v3 = vunpack.c.h.bf16 %v1330_v58  ;;  %v1065_v4 = vunpack.c.l.bf16 %v1330_v58 }
   0x8   :  { %1120 = vmatprep.subr.bf16.mxu1 %v1195_v0  ;;  %1112 = vmatprep.subr.bf16.mxu0 %v1195_v0  ;;  %v1061_v59 = vunpack.c.l.bf16 %v1322_v51  ;;  %v1062_v63 = vunpack.c.h.bf16 %v1322_v51 }
   0xa   :  { %1109 = vmatmul.mubr.msk.bf16.vlgmr.msra.gmra.mrb[0].mxu1 %vm38_vm1, %v40_v6  ;;  %v41_v7 = vld [vmem:[#allocation2] sm:$0xff] }
   0xb   :  { %1124 = vmatprep.mubr.msk.bf16.mxu1 %vm1196_vm0, %v1195_v0  ;;  %v54_v8 = vpack.c.bf16 %v41_v7, %v41_v7 }
   0xd   :  { %1101 = vmatmul.mubr.msk.bf16.vlgmr.msra.gmra.mrb[0].mxu0 %vm38_vm1, %v54_v8 }
   0xe   :  { %1116 = vmatprep.mubr.msk.bf16.mxu0 %vm1196_vm0, %v1195_v0  ;;  %1113 = vmatpush3.bf16.msra.mxu0 %v1157_v28 }
   0xf   :  { %1114 = vmatprep.subr.bf16.mxu0 %v1195_v0 }
  0x12   :  { %1115 = vmatpush3.bf16.msra.mxu0 %v1158_v30 }
  0x13   :  { %1128 = vmatprep.subr.bf16.mxu0 %v1195_v0 }
  0xdd   :  { %v164_v9 = vpop.f32.mrb[0].mxu1 }
  0xde   :  { %v1110_v10 = vpop.f32.mrb[1].mxu1 }
  0xdf   :  { %v167_v11 = vpop.f32.mrb[2].mxu1 }
  0xe0   :  { %v1111_v12 = vpop.f32.mrb[3].mxu1  ;;  %v109_v13 = vpop.f32.mrb[0].mxu0 }
  0xe1   :  { %v165_v15 = vadd.f32 %v164_v9, %v109_v13  ;;  %v1102_v16 = vpop.f32.mrb[1].mxu0 }
  0xe2   :  { %v112_v17 = vpop.f32.mrb[2].mxu0  ;;  %v1069_v16 = vunpack.c.l.bf16 %v1340_v5 }
  0xe3   :  { %v177_v18 = vadd.f32 %v1042_v14, %v165_v15  ;;  %v1103_v19 = vpop.f32.mrb[3].mxu0  ;;  %v1070_v15 = vunpack.c.h.bf16 %v1340_v5 }
  0xe5   :  { %185 = vrot.lane.b32.xlu0 %v177_v18, %s1197_s3  ;;  %v1043_v20 = vmul.f32 -1.442695, %v177_v18 }
  0xe7   :  { %1165 = vpow2.f32 %v1043_v20 }
  0xf1   :  { %v1166_v21 = vpop.eup %1165 }
  0xf2   :  { %v181_v22 = vadd.f32 1.0, %v1166_v21 }
  0xf4   :  { %1167 = vrcp.f32 %v181_v22 }
  0xfe   :  { %v1168_v23 = vpop.eup %1167 }
  0xff   :  { %v195_v32 = vsub.f32 1.0, %v1168_v23 }
 0x157   :  { %v186_v24 = vpop.permute.xlu0 %185 }
 0x158   :  { %v188_v25 = vmul.f32 %v1168_v23, %v186_v24 }
 0x15a   :  { %190 = vrot.lane.b32.xlu0 %v188_v25, %s1198_s21 }
 0x1cc   :  { %v191_v26 = vpop.permute.xlu0 %190 }
 0x1cd   :  { %v193_v27 = vadd.f32 %v191_v26, %v177_v18 }
 0x1cf   :  { %1169 = vtanh.f32 %v193_v27  ;;  %v1364_v27 = vld [vmem:[%s1557_s2 + $0x18] sm:$0xff]  }
 0x1d0   :  { %v1074_v30 = vunpack.c.h.bf16 %v1364_v27 }
 0x1d9   :  { %v1170_v29 = vpop.eup %1169 }
 0x1da   :  { %197 = vrot.lane.b32.xlu1 %v1170_v29, %s1199_s23 }
 0x1de   :  { %202 = vrot.lane.b32.xlu1 %v41_v7, %s1197_s3 }
 0x24c   :  { %v198_v31 = vpop.permute.xlu1 %197 }
 0x24d   :  { %v200_v34 = vmul.f32 %v198_v31, %v195_v32 }
 0x250   :  { %v203_v33 = vpop.permute.xlu1 %202 }
 0x251   :  { %v205_v35 = vmul.f32 %v1168_v23, %v203_v33 }
 0x253   :  { %v1299_v36 = vadd.f32 %v205_v35, %v200_v34  ;;  %v1073_v34 = vunpack.c.l.bf16 %v1364_v27 }
 0x255   :  { %v212_v37 = vpack.c.bf16 %v1299_v36, %v1299_v36 }
 0x257   :  { %218 = vrot.lane.b32.xlu0 %v212_v37, %s1199_s23 }
 0x2c9   :  { %v219_v39 = vpop.permute.xlu0 %218 }
 0x2ca   :  { %1117 = vmatmul.mubr.msk.bf16.vlgmr.msra.gmra.mrb[4].mxu0 %vm38_vm1, %v219_v39 }
 0x2cb   :  { %1129 = vmatpush3.bf16.msra.mxu0 %v1159_v38  ;;  %1132 = vmatprep.mubr.msk.bf16.mxu0 %vm1196_vm0, %v1195_v0 }
 0x2cc   :  { %1130 = vmatprep.subr.bf16.mxu0 %v1195_v0 }
 0x2cf   :  { %1131 = vmatpush3.bf16.msra.mxu0 %v1160_v40 }
 0x2d2   :  { %1133 = vmatmul.mubr.msk.bf16.vlgmr.msra.gmra.mrb[8].mxu0 %vm38_vm1, %v219_v39 }
 0x39d   :  { %v269_v47 = vpop.f32.mrb[4].mxu0 }
 0x39e   :  { %v276_v48 = vcombine.high %v269_v47, %v269_v47  ;;  %v283_v49 = vrot.slane %v269_v47, %v282_v46  ;;  %v1118_v50 = vpop.f32.mrb[5].mxu0  ;;  %v1389_v47 = vsub.s32 %v1385_v44, %v1316_v45 }
 0x39f   :  { %v272_v52 = vpop.f32.mrb[6].mxu0 }
 0x3a0   :  { %v290_v54 = vrot.slane %v276_v48, %v282_v46  ;;  %v291_v55 = vcombine.high %v283_v49, %v283_v49  ;;  %v299_v56 = vrot.slane %v283_v49, %v282_v46  ;;  %v1119_v57 = vpop.f32.mrb[7].mxu0 }
 0x3a2   :  { %v292_v60 = vcombine.high %v290_v54, %v290_v54  ;;  %v313_v61 = vrot.slane %v291_v55, %v282_v46  ;;  %v321_v62 = vcombine.high %v299_v56, %v299_v56  ;;  %v306_v1 = vrot.slane %v290_v54, %v282_v46 }
 0x3a3   :  { %v336_v2 = vrot.slane %v299_v56, %v1325_v53 }
 0x3a4   :  { %v340_v6 = vrot.slane %v313_v61, %v1325_v53  ;;  %v323_v7 = vcombine.high %v313_v61, %v313_v61  ;;  %v344_v8 = vrot.slane %v321_v62, %v1325_v53  ;;  %v320_v9 = vrot.slane %v292_v60, %v282_v46 }
 0x3a5   :  { %v1344_v10 = vpop.f32.mrb[8].mxu0  ;;  %v373_v11 = vmul.f32 %v1061_v59, %v336_v2  ;;  %v352_v20 = vrot.slane %v306_v1, %v1325_v53  ;;  %v322_v26 = vcombine.high %v306_v1, %v306_v1 }
 0x3a6   :  { %v1134_v12 = vpop.f32.mrb[9].mxu0  ;;  %v374_v13 = vmul.f32 %v1062_v63, %v340_v6  ;;  %v348_v14 = vrot.slane %v323_v7, %v1325_v53  ;;  %v356_v19 = vrot.slane %v320_v9, %v1325_v53  ;;  %v324_v21 = vcombine.high %v320_v9, %v320_v9 }
 0x3a7   :  { %v381_v17 = vsel %vm38_vm1, %v373_v11, 0.0  ;;  %v904_v18 = vpop.f32.mrb[10].mxu0  ;;  %v375_v25 = vmul.f32 %v1065_v4, %v344_v8  ;;  %v377_v33 = vmul.f32 %v1069_v16, %v352_v20  ;;  %v360_v35 = vrot.slane %v322_v26, %v1325_v53 }
 0x3a8   :  { %382 = vadd.xlane.f32.xlu1 %v381_v17  ;;  %v1135_v22 = vpop.f32.mrb[11].mxu0  ;;  %v384_v23 = vsel %vm38_vm1, %v374_v13, 0.0  ;;  %v376_v24 = vmul.f32 %v1066_v3, %v348_v14  ;;  %v378_v29 = vmul.f32 %v1070_v15, %v356_v19  ;;  %v364_v31 = vrot.slane %v324_v21, %v1325_v53 }
 0x3a9   :  { %385 = vadd.xlane.f32.xlu0 %v384_v23  ;;  %v387_v32 = vsel %vm38_vm1, %v375_v25, 0.0  ;;  %v393_v39 = vsel %vm38_vm1, %v377_v33, 0.0  ;;  %v379_v40 = vmul.f32 %v1073_v34, %v360_v35  ;;  %v1201_v18 = vmov 0  }
 0x3aa   :  { %v390_v28 = vsel %vm38_vm1, %v376_v24, 0.0  ;;  %v396_v37 = vsel %vm38_vm1, %v378_v29, 0.0  ;;  %v380_v38 = vmul.f32 %v1074_v30, %v364_v31  ;;  %1152 = vset.pattern.permute.xlu0 %v1201_v18  ;;  %1151 = vset.pattern.permute.xlu1 %v1201_v18  ;;  %v473_v19 = vsub.s32 1, %v1316_v45 }
 0x3ab   :  { %v399_v42 = vsel %vm38_vm1, %v379_v40, 0.0  ;;  %v477_v20 = vsub.s32 2, %v1316_v45  ;;  %v481_v21 = vsub.s32 3, %v1316_v45  ;;  %v485_v26 = vsub.s32 4, %v1316_v45 }
 0x3ac   :  { %391 = vadd.xlane.f32.xlu1 %v390_v28  ;;  %v402_v41 = vsel %vm38_vm1, %v380_v38, 0.0 }
 0x3ad   :  { %388 = vadd.xlane.f32.xlu0 %v387_v32 }
 0x3b0   :  { %397 = vadd.xlane.f32.xlu1 %v396_v37  ;;  %v489_v37 = vsub.s32 5, %v1316_v45 }
 0x3b1   :  { %394 = vadd.xlane.f32.xlu0 %v393_v39 }
 0x3b4   :  { %403 = vadd.xlane.f32.xlu1 %v402_v41  ;;  %v493_v41 = vsub.s32 6, %v1316_v45 }
 0x3b5   :  { %400 = vadd.xlane.f32.xlu0 %v399_v42 }
 0x435   :  { %v383_v46 = vpop.xlane.xlu1 %382 }
 0x436   :  { %v386_v48 = vpop.xlane.xlu0 %385  ;;  %v418_v52 = vrot.slane %v383_v46, %v1389_v47 }
 0x437   :  { %v422_v49 = vrot.slane %v386_v48, %v1389_v47 }
 0x439   :  { %v392_v50 = vpop.xlane.xlu1 %391  ;;  %v448_v56 = vsel %vm447_vm2, %v422_v49, %v418_v52 }
 0x43a   :  { %v389_v54 = vpop.xlane.xlu0 %388  ;;  %v430_v60 = vrot.slane %v392_v50, %v1389_v47 }
 0x43b   :  { %v426_v55 = vrot.slane %v389_v54, %v1389_v47 }
 0x43d   :  { %v450_v43 = vsel %vm449_vm3, %v426_v55, %v448_v56  ;;  %v398_v57 = vpop.xlane.xlu1 %397 }
 0x43e   :  { %v395_v61 = vpop.xlane.xlu0 %394  ;;  %v452_v1 = vsel %vm451_vm4, %v430_v60, %v450_v43  ;;  %v438_v7 = vrot.slane %v398_v57, %v1389_v47 }
 0x43f   :  { %v434_v62 = vrot.slane %v395_v61, %v1389_v47 }
 0x441   :  { %v454_v2 = vsel %vm453_vm5, %v434_v62, %v452_v1  ;;  %v1400_v6 = vpop.xlane.xlu1 %403 }
 0x442   :  { %v401_v8 = vpop.xlane.xlu0 %400  ;;  %v446_v11 = vrot.slane %v1400_v6, %v1389_v47  ;;  %v456_v12 = vsel %vm455_vm6, %v438_v7, %v454_v2 }
 0x443   :  { %v442_v9 = vrot.slane %v401_v8, %v1389_v47 }
 0x445   :  { %v458_v13 = vsel %vm457_vm7, %v442_v9, %v456_v12 }
 0x446   :  { %v460_v14 = vsel %vm459_vm8, %v446_v11, %v458_v13 }
 0x447   :  { %v463_v17 = vsel %vm462_vm9, %v460_v14, -inf }
 0x448   :  { %464 = vmax.xlane.f32.xlu0 %v463_v17 }
 0x4d5   :  { %v465_v22 = vpop.xlane.xlu0 %464 }
 0x4d6   :  { %v470_v23 = vrot.slane %v465_v22, %v1325_v53  ;;  %v474_v24 = vrot.slane %v465_v22, %v473_v19  ;;  %v478_v25 = vrot.slane %v465_v22, %v477_v20  ;;  %v482_v28 = vrot.slane %v465_v22, %v481_v21 }
 0x4d7   :  { %v486_v38 = vrot.slane %v465_v22, %v485_v26  ;;  %v490_v42 = vrot.slane %v465_v22, %v489_v37  ;;  %v494_v52 = vrot.slane %v465_v22, %v493_v41 }
 0x4d8   :  { %v507_v29 = vsub.f32 %v383_v46, %v470_v23  ;;  %v508_v31 = vsub.f32 %v386_v48, %v474_v24  ;;  %v509_v32 = vsub.f32 %v389_v54, %v478_v25  ;;  %v510_v39 = vsub.f32 %v392_v50, %v482_v28 }
 0x4d9   :  { %v511_v49 = vsub.f32 %v395_v61, %v486_v38  ;;  %v497_v48 = vsub.s32 7, %v1316_v45  ;;  %v512_v54 = vsub.f32 %v398_v57, %v490_v42  ;;  %v513_v60 = vsub.f32 %v401_v8, %v494_v52 }
 0x4da   :  { %v515_v33 = vmul.f32 1.442695, %v507_v29  ;;  %v517_v35 = vmul.f32 1.442695, %v508_v31  ;;  %v519_v40 = vmul.f32 1.442695, %v509_v32 }
 0x4db   :  { %v521_v46 = vmul.f32 1.442695, %v510_v39  ;;  %v523_v55 = vmul.f32 1.442695, %v511_v49  ;;  %v498_v43 = vrot.slane %v465_v22, %v497_v48  ;;  %v525_v62 = vmul.f32 1.442695, %v512_v54 }
 0x4dc   :  { %1171 = vpow2.f32 %v515_v33  ;;  %v527_v2 = vmul.f32 1.442695, %v513_v60 }
 0x4dd   :  { %1173 = vpow2.f32 %v517_v35  ;;  %v514_v1 = vsub.f32 %v1400_v6, %v498_v43 }
 0x4de   :  { %1175 = vpow2.f32 %v519_v40 }
 0x4df   :  { %1177 = vpow2.f32 %v521_v46  ;;  %v529_v57 = vmul.f32 1.442695, %v514_v1 }
 0x4e0   :  { %1179 = vpow2.f32 %v523_v55 }
 0x4e1   :  { %1181 = vpow2.f32 %v525_v62 }
 0x4e2   :  { %1183 = vpow2.f32 %v527_v2 }
 0x4e3   :  { %1185 = vpow2.f32 %v529_v57 }
 0x4e6   :  { %v1172_v50 = vpop.eup %1171 }
 0x4e7   :  { %v1174_v56 = vpop.eup %1173  ;;  %540 = vperm.xlu1 %1151, %v1172_v50  }
 0x4e8   :  { %543 = vperm.xlu0 %1152, %v1174_v56   ;;  %v1176_v61 = vpop.eup %1175 }
 0x4e9   :  { %v1178_v7 = vpop.eup %1177 }
 0x4ea   :  { %v1180_v9 = vpop.eup %1179 }
 0x4eb   :  { %546 = vperm.xlu1 %1151, %v1176_v61   ;;  %v1182_v11 = vpop.eup %1181 }
 0x4ec   :  { %v1184_v12 = vpop.eup %1183 }
 0x4ed   :  { %v1186_v8 = vpop.eup %1185 }
 0x4ef   :  { %549 = vperm.xlu1 %1151, %v1178_v7  }
 0x4f3   :  { %552 = vperm.xlu1 %1151, %v1180_v9  }
 0x4f7   :  { %555 = vperm.xlu1 %1151, %v1182_v11  }
 0x4fb   :  { %558 = vperm.xlu1 %1151, %v1184_v12  }
 0x4ff   :  { %561 = vperm.xlu1 %1151, %v1186_v8  }
 0x566   :  { %v541_v13 = vpop.permute.xlu1 %540 }
 0x567   :  { %v544_v6 = vpop.permute.xlu0 %543  ;;  %v566_v24 = vrot.slane %v541_v13, %v1389_v47 }
 0x568   :  { %v570_v23 = vrot.slane %v544_v6, %v1389_v47 }
 0x56a   :  { %v547_v14 = vpop.permute.xlu1 %546  ;;  %v595_v32 = vsel %vm447_vm2, %v570_v23, %v566_v24 }
 0x56b   :  { %v574_v25 = vrot.slane %v547_v14, %v1389_v47 }
 0x56d   :  { %v596_v35 = vsel %vm449_vm3, %v574_v25, %v595_v32 }
 0x56e   :  { %v550_v17 = vpop.permute.xlu1 %549 }
 0x56f   :  { %v578_v28 = vrot.slane %v550_v17, %v1389_v47 }
 0x571   :  { %v597_v39 = vsel %vm451_vm4, %v578_v28, %v596_v35 }
 0x572   :  { %v553_v18 = vpop.permute.xlu1 %552 }
 0x573   :  { %v582_v29 = vrot.slane %v553_v18, %v1389_v47 }
 0x575   :  { %v598_v40 = vsel %vm453_vm5, %v582_v29, %v597_v39 }
 0x576   :  { %v556_v22 = vpop.permute.xlu1 %555 }
 0x577   :  { %v586_v33 = vrot.slane %v556_v22, %v1389_v47 }
 0x579   :  { %v599_v49 = vsel %vm455_vm6, %v586_v33, %v598_v40 }
 0x57a   :  { %v559_v31 = vpop.permute.xlu1 %558 }
 0x57b   :  { %v590_v38 = vrot.slane %v559_v31, %v1389_v47 }
 0x57d   :  { %v600_v52 = vsel %vm457_vm7, %v590_v38, %v599_v49 }
 0x57e   :  { %v562_v42 = vpop.permute.xlu1 %561 }
 0x57f   :  { %v594_v46 = vrot.slane %v562_v42, %v1389_v47 }
 0x581   :  { %v601_v54 = vsel %vm459_vm8, %v594_v46, %v600_v52 }
 0x582   :  { %v603_v55 = vsel %vm462_vm9, %v601_v54, 0.0 }
 0x583   :  { %604 = vadd.xlane.f32.xlu1 %v603_v55 }
 0x594   :  { %208 = vrot.lane.b32.xlu1 %v1299_v36, %s1199_s23 }
 0x610   :  { %v605_v43 = vpop.xlane.xlu1 %604 }
 0x611   :  { %1187 = vrcp.f32 %v605_v43 }
 0x614   :  { %v209_v60 = vpop.permute.xlu1 %208 }
 0x615   :  { %211 = vst.msk [vmem:[#allocation2] sm:$0xff] %vm38_vm1, %v209_v60 }
 0x61b   :  { %v1188_v62 = vpop.eup %1187 }
 0x61c   :  { %v611_v1 = vrot.slane %v1188_v62, %v1325_v53  ;;  %v615_v47 = vrot.slane %v1188_v62, %v473_v19  ;;  %v619_v13 = vrot.slane %v1188_v62, %v477_v20  ;;  %v623_v17 = vrot.slane %v1188_v62, %v481_v21 }
 0x61d   :  { %v627_v6 = vrot.slane %v1188_v62, %v485_v26  ;;  %v631_v19 = vrot.slane %v1188_v62, %v489_v37  ;;  %v635_v20 = vrot.slane %v1188_v62, %v493_v41  ;;  %v639_v21 = vrot.slane %v1188_v62, %v497_v48  ;;  %v1161_v26 = vld [vmem:[%s1556_s6 + $0x10] sm:$0xff]   ;;  %v1162_v37 = vld [vmem:[%s1556_s6 + $0x18] sm:$0xff]  }
 0x61e   :  { %v648_v2 = vmul.f32 %v1172_v50, %v611_v1  ;;  %v649_v57 = vmul.f32 %v1174_v56, %v615_v47  ;;  %v650_v14 = vmul.f32 %v1176_v61, %v619_v13  ;;  %v651_v18 = vmul.f32 %v1178_v7, %v623_v17  ;;  %1121 = vmatpush3.bf16.msra.mxu1 %v1161_v26 }
 0x61f   :  { %v652_v53 = vmul.f32 %v1180_v9, %v627_v6  ;;  %v653_v50 = vmul.f32 %v1182_v11, %v631_v19  ;;  %v654_v56 = vmul.f32 %v1184_v12, %v635_v20  ;;  %v655_v61 = vmul.f32 %v1186_v8, %v639_v21  ;;  %1122 = vmatprep.subr.bf16.mxu1 %v1195_v0 }
 0x620   :  { %658 = vperm.xlu0 %1152, %v648_v2   ;;  %v985_v41 = vadd.s32 4294967232, %v1385_v44 }
 0x622   :  { %1123 = vmatpush3.bf16.msra.mxu1 %v1162_v37  ;;  %v1477_v7 = vsub.s32 %v985_v41, %v1316_v45 }
 0x623   :  { %1136 = vmatprep.subr.bf16.mxu1 %v1195_v0 }
 0x624   :  { %663 = vperm.xlu0 %1152, %v649_v57  }
 0x628   :  { %668 = vperm.xlu0 %1152, %v650_v14  }
 0x62c   :  { %673 = vperm.xlu0 %1152, %v651_v18  }
 0x630   :  { %678 = vperm.xlu0 %1152, %v652_v53  }
 0x634   :  { %683 = vperm.xlu0 %1152, %v653_v50  }
 0x638   :  { %688 = vperm.xlu0 %1152, %v654_v56  }
 0x63c   :  { %693 = vperm.xlu0 %1152, %v655_v61  }
 0x69f   :  { %v659_v48 = vpop.permute.xlu0 %658 }
 0x6a0   :  { %v696_v11 = vmul.f32 %v1061_v59, %v659_v48  ;;  %v989_v12 = vrot.slane %v659_v48, %v1477_v7 }
 0x6a2   :  { %v704_v25 = vsel %vm38_vm1, %v696_v11, 0.0 }
 0x6a3   :  { %v664_v9 = vpop.permute.xlu0 %663 }
 0x6a4   :  { %v697_v8 = vmul.f32 %v1062_v63, %v664_v9  ;;  %v993_v22 = vrot.slane %v664_v9, %v1477_v7  ;;  %v705_v63 = vrot.slane %v704_v25, 4 }
 0x6a6   :  { %v711_v23 = vsel %vm38_vm1, %v697_v8, 0.0  ;;  %v1018_v24 = vsel %vm447_vm2, %v993_v22, %v989_v12  ;;  %v706_v42 = vadd.f32 %v705_v63, %v704_v25 }
 0x6a7   :  { %v669_v44 = vpop.permute.xlu0 %668  ;;  %v712_v59 = vrot.slane %v711_v23, 4 }
 0x6a8   :  { %v698_v45 = vmul.f32 %v1065_v4, %v669_v44  ;;  %v997_v28 = vrot.slane %v669_v44, %v1477_v7  ;;  %v707_v62 = vrot.slane %v706_v42, 2 }
 0x6a9   :  { %v713_v38 = vadd.f32 %v712_v59, %v711_v23 }
 0x6aa   :  { %v718_v29 = vsel %vm38_vm1, %v698_v45, 0.0  ;;  %v1019_v51 = vsel %vm449_vm3, %v997_v28, %v1018_v24  ;;  %v708_v53 = vadd.f32 %v707_v62, %v706_v42 }
 0x6ab   :  { %v719_v31 = vrot.slane %v718_v29, 4  ;;  %v674_v32 = vpop.permute.xlu0 %673  ;;  %v714_v55 = vrot.slane %v713_v38, 2 }
 0x6ac   :  { %v699_v33 = vmul.f32 %v1066_v3, %v674_v32  ;;  %v1001_v35 = vrot.slane %v674_v32, %v1477_v7  ;;  %v709_v9 = vrot.slane %v708_v53, 1 }
 0x6ad   :  { %v720_v39 = vadd.f32 %v719_v31, %v718_v29  ;;  %v715_v14 = vadd.f32 %v714_v55, %v713_v38 }
 0x6ae   :  { %v725_v40 = vsel %vm38_vm1, %v699_v33, 0.0  ;;  %v1020_v4 = vsel %vm451_vm4, %v1001_v35, %v1019_v51  ;;  %v710_v51 = vadd.f32 %v709_v9, %v708_v53 }
 0x6af   :  { %v726_v49 = vrot.slane %v725_v40, 4  ;;  %v679_v46 = vpop.permute.xlu0 %678  ;;  %v721_v58 = vrot.slane %v720_v39, 2 }
 0x6b0   :  { %v700_v52 = vmul.f32 %v1069_v16, %v679_v46  ;;  %v1005_v54 = vrot.slane %v679_v46, %v1477_v7 }
 0x6b1   :  { %v727_v43 = vadd.f32 %v726_v49, %v725_v40  ;;  %v722_v17 = vadd.f32 %v721_v58, %v720_v39  ;;  %v764_v40 = vpack.c.bf16 %v710_v51, %v710_v51 }
 0x6b2   :  { %v732_v3 = vsel %vm38_vm1, %v700_v52, 0.0  ;;  %v1021_v60 = vsel %vm453_vm5, %v1005_v54, %v1020_v4 }
 0x6b3   :  { %v728_v1 = vrot.slane %v727_v43, 2  ;;  %v733_v2 = vrot.slane %v732_v3, 4  ;;  %v684_v47 = vpop.permute.xlu0 %683  ;;  %v723_v26 = vrot.slane %v722_v17, 1 }
 0x6b4   :  { %v701_v57 = vmul.f32 %v1070_v15, %v684_v47  ;;  %v1009_v13 = vrot.slane %v684_v47, %v1477_v7  ;;  %v716_v15 = vrot.slane %v715_v14, 1 }
 0x6b5   :  { %v734_v16 = vadd.f32 %v733_v2, %v732_v3  ;;  %v729_v19 = vadd.f32 %v728_v1, %v727_v43  ;;  %v724_v45 = vadd.f32 %v723_v26, %v722_v17  ;;  %v784_v3 = vunpack.c.l.b16 %v764_v40 }
 0x6b6   :  { %v739_v18 = vsel %vm38_vm1, %v701_v57, 0.0  ;;  %v1022_v6 = vsel %vm455_vm6, %v1009_v13, %v1021_v60  ;;  %v717_v44 = vadd.f32 %v716_v15, %v715_v14 }
 0x6b7   :  { %v735_v50 = vrot.slane %v734_v16, 2  ;;  %v689_v20 = vpop.permute.xlu0 %688  ;;  %v740_v56 = vrot.slane %v739_v18, 4  ;;  %v730_v11 = vrot.slane %v729_v19, 1  ;;  %v766_v39 = vpack.c.bf16 %v724_v45, %v724_v45 }
 0x6b8   :  { %v702_v21 = vmul.f32 %v1073_v34, %v689_v20  ;;  %v1013_v5 = vrot.slane %v689_v20, %v1477_v7  ;;  %v765_v38 = vpack.c.bf16 %v717_v44, %v717_v44 }
 0x6b9   :  { %v736_v61 = vadd.f32 %v735_v50, %v734_v16  ;;  %v741_v37 = vadd.f32 %v740_v56, %v739_v18  ;;  %v731_v63 = vadd.f32 %v730_v11, %v729_v19  ;;  %v786_v58 = vunpack.c.l.b16 %v766_v39 }
 0x6ba   :  { %v746_v41 = vsel %vm38_vm1, %v702_v21, 0.0  ;;  %v1023_v48 = vsel %vm457_vm7, %v1013_v5, %v1022_v6  ;;  %v785_v52 = vunpack.c.l.b16 %v765_v38  ;;  %v1163_v21 = vld [vmem:[%s1558_s7] sm:$0xff]   ;;  %v1164_v5 = vld [vmem:[%s1558_s7 + $0x8] sm:$0xff]  }
 0x6bb   :  { %v747_v12 = vrot.slane %v746_v41, 4  ;;  %v694_v8 = vpop.permute.xlu0 %693  ;;  %v737_v22 = vrot.slane %v736_v61, 1  ;;  %v742_v23 = vrot.slane %v741_v37, 2  ;;  %v767_v4 = vpack.c.bf16 %v731_v63, %v731_v63 }
 0x6bc   :  { %v703_v24 = vmul.f32 %v1074_v30, %v694_v8  ;;  %v1017_v34 = vrot.slane %v694_v8, %v1477_v7  ;;  %v792_v47 = vsel %vm447_vm2, %v785_v52, %v784_v3 }
 0x6bd   :  { %v748_v25 = vadd.f32 %v747_v12, %v746_v41  ;;  %v743_v28 = vadd.f32 %v742_v23, %v741_v37  ;;  %v738_v33 = vadd.f32 %v737_v22, %v736_v61  ;;  %v787_v60 = vunpack.c.l.b16 %v767_v4  ;;  %v1053_v61 = vld [vmem:[%s1559_s8] ss:$0 sm:$0xff] }
 0x6be   :  { %v753_v59 = vsel %vm38_vm1, %v703_v24, 0.0  ;;  %v1518_v29 = vsel %vm459_vm8, %v1017_v34, %v1023_v48  ;;  %v793_v14 = vsel %vm449_vm3, %v786_v58, %v792_v47 }
 0x6bf   :  { %v749_v31 = vrot.slane %v748_v25, 2  ;;  %v754_v32 = vrot.slane %v753_v59, 4  ;;  %v744_v35 = vrot.slane %v743_v28, 1  ;;  %v768_v46 = vpack.c.bf16 %v738_v33, %v738_v33 }
 0x6c0   :  { %v794_v17 = vsel %vm451_vm4, %v787_v60, %v793_v14 }
 0x6c1   :  { %v750_v27 = vadd.f32 %v749_v31, %v748_v25  ;;  %v755_v30 = vadd.f32 %v754_v32, %v753_v59  ;;  %v745_v7 = vadd.f32 %v744_v35, %v743_v28  ;;  %v788_v2 = vunpack.c.l.b16 %v768_v46 }
 0x6c3   :  { %v751_v42 = vrot.slane %v750_v27, 1  ;;  %v756_v49 = vrot.slane %v755_v30, 2  ;;  %v769_v54 = vpack.c.bf16 %v745_v7, %v745_v7  ;;  %v795_v6 = vsel %vm453_vm5, %v788_v2, %v794_v17 }
 0x6c5   :  { %v752_v55 = vadd.f32 %v751_v42, %v750_v27  ;;  %v757_v43 = vadd.f32 %v756_v49, %v755_v30  ;;  %v789_v57 = vunpack.c.l.b16 %v769_v54 }
 0x6c7   :  { %v770_v62 = vpack.c.bf16 %v752_v55, %v752_v55  ;;  %v758_v1 = vrot.slane %v757_v43, 1  ;;  %v796_v53 = vsel %vm455_vm6, %v789_v57, %v795_v6 }
 0x6c9   :  { %v759_v13 = vadd.f32 %v758_v1, %v757_v43  ;;  %v790_v16 = vunpack.c.l.b16 %v770_v62 }
 0x6cb   :  { %v771_v18 = vpack.c.bf16 %v759_v13, %v759_v13  ;;  %v797_v50 = vsel %vm457_vm7, %v790_v16, %v796_v53 }
 0x6cd   :  { %v791_v19 = vunpack.c.l.b16 %v771_v18 }
 0x6cf   :  { %v798_v20 = vsel %vm459_vm8, %v791_v19, %v797_v50 }
 0x6d0   :  { %v799_v56 = vpack.c.b16 %v798_v20, %v798_v20 }
 0x6d2   :  { %1125 = vmatmul.mubr.msk.bf16.vlgmr.msra.gmra.mrb[4].mxu1 %vm38_vm1, %v799_v56 }
 0x6d3   :  { %1140 = vmatprep.mubr.msk.bf16.mxu1 %vm1196_vm0, %v1195_v0  ;;  %1137 = vmatpush3.bf16.msra.mxu1 %v1163_v21 }
 0x6d4   :  { %1138 = vmatprep.subr.bf16.mxu1 %v1195_v0  ;;  %v1054_v0 = vld [vmem:[%s1559_s8 + $0x1] ss:$0 sm:$0xff] }
 0x6d7   :  { %1139 = vmatpush3.bf16.msra.mxu1 %v1164_v5 }
 0x7a5   :  { %v849_v15 = vpop.f32.mrb[4].mxu1 }
 0x7a6   :  { %v902_v26 = vadd.f32 %v1344_v10, %v849_v15  ;;  %v1126_v37 = vpop.f32.mrb[5].mxu1 }
 0x7a7   :  { %v852_v41 = vpop.f32.mrb[6].mxu1 }
 0x7a8   :  { %v912_v48 = vadd.f32 %v1053_v61, %v902_v26  ;;  %v1127_v9 = vpop.f32.mrb[7].mxu1 }
 0x7aa   :  { %1189 = vtanh.f32 %v912_v48 }
 0x7b4   :  { %v1190_v11 = vpop.eup %1189 }
 0x7b5   :  { %v914_v12 = vpack.c.bf16 %v1190_v11, %v1190_v11 }
 0x7b7   :  { %1141 = vmatmul.mubr.msk.bf16.vlgmr.msra.gmra.mrb[8].mxu1 %vm38_vm1, %v914_v12 }
 0x88a   :  { %v973_v8 = vpop.f32.mrb[8].mxu1 }
 0x88b   :  { %v974_v22 = vadd.f32 %v1054_v0, %v973_v8  ;;  %v1142_v23 = vpop.f32.mrb[9].mxu1 }
 0x88c   :  { %v976_v24 = vpop.f32.mrb[10].mxu1 }
 0x88d   :  { %v1058_v34 = vmul.f32 -1.442695, %v974_v22  ;;  %v1143_v44 = vpop.f32.mrb[11].mxu1 }
 0x88f   :  { %1191 = vpow2.f32 %v1058_v34 }
 0x899   :  { %v1192_v10 = vpop.eup %1191 }
 0x89a   :  { %v982_v25 = vadd.f32 1.0, %v1192_v10 }
 0x89c   :  { %1193 = vrcp.f32 %v982_v25 }
 0x8a6   :  { %v1194_v45 = vpop.eup %1193 }
 0x8a7   :  { %v1026_v28 = vsel %vm38_vm1, %v1194_v45, %v1299_v36 }
 0x8a8   :  { %v1028_v59 = vsel %vm1027_vm10, %v1026_v28, %v1518_v29 }
 0x8a9   :  { %v1030_v51 = vsel %vm1029_vm11, %v1028_v59, 0.0 }
 0x8aa   :  { %1031 = vst [vmem:[%s1560_s9] sm:$0xff] %v1030_v51 }

</bundles_post_ra>
